<compile_context>
chip_gen: v6e
topology: v6e:2x2x1
jax: 0.10.0
libtpu: 0.0.40
codegen_flags: <defaults>
</compile_context>

<pallas_src>
import functools

import jax
import jax.numpy as jnp
from jax import lax
from jax.experimental import pallas as pl
from jax.experimental.pallas import tpu as pltpu

H1 = 128   # fc1 width
H2 = 64    # fc2 width (kept at logical size; (64, TB) is a legal f32/bf16 tile)


def _round_up(n, m):
    return ((n + m - 1) // m) * m


def _choose_tiling(batch, tile_b):
    """Pick (tb, b_pad, n_tiles): tb a multiple of 128, padding waste bounded,
    and >= 2 tiles whenever possible so both v7x TensorCores get work."""
    b128 = _round_up(max(batch, 1), 128)
    min_tiles = 2 if b128 >= 256 else 1
    n_tiles = max(pl.cdiv(b128, tile_b), min_tiles)
    tb = _round_up(pl.cdiv(b128, n_tiles), 128)
    return tb, tb * n_tiles, n_tiles


def elo_mlp_kernel(x_ref, w1t_ref, b1_ref, w2t_ref, b2_ref, w3_ref, b3_ref, o_ref):
    # x tile arrives in natural (TB, input_size) f32 layout; cast to bf16 and
    # contract the shared `input` axis so batch lands on the lane axis.
    xb = x_ref[...].astype(jnp.bfloat16)                           # (TB, in)

    # fc1 + ReLU: (H1, in) x (TB, in)^T -> (H1, TB), f32 accumulation.
    h1 = lax.dot_general(w1t_ref[...], xb, (((1,), (1,)), ((), ())),
                         preferred_element_type=jnp.float32)
    h1 = jnp.maximum(h1 + b1_ref[...], 0.0)                        # (H1, TB) f32
    # dropout1: identity at inference.

    # fc2 + ReLU: (H2, H1) x (H1, TB) -> (H2, TB).
    h2 = jnp.dot(w2t_ref[...], h1.astype(jnp.bfloat16),
                 preferred_element_type=jnp.float32)
    h2 = jnp.maximum(h2 + b2_ref[...], 0.0)                        # (H2, TB) f32
    # dropout2: identity at inference.

    # fc3 (N=1): VPU broadcast-multiply + sublane reduce instead of a wasted
    # M=1 MXU pass; result is a lane-dense (1, TB) row. b3 read from SMEM.
    out = jnp.sum(h2 * w3_ref[...], axis=0, keepdims=True) + b3_ref[0, 0]
    o_ref[...] = out.astype(o_ref.dtype)


def pack_params(params):
    """One-time weight packing (transpose + bf16 cast), hoisted out of the
    per-call path so only x prep happens per forward."""
    w1, b1, w2, b2, w3, b3 = params
    w1t = jnp.asarray(w1, jnp.float32).T.astype(jnp.bfloat16)      # (H1, in)
    b1c = jnp.asarray(b1, jnp.float32).reshape(H1, 1)              # (H1, 1)
    w2t = jnp.asarray(w2, jnp.float32).T.astype(jnp.bfloat16)      # (H2, H1)
    b2c = jnp.asarray(b2, jnp.float32).reshape(H2, 1)              # (H2, 1)
    w3c = jnp.asarray(w3, jnp.float32).reshape(H2, 1)              # (H2, 1)
    b3c = jnp.asarray(b3, jnp.float32).reshape(1, 1)               # (1, 1) -> SMEM
    return (w1t, b1c, w2t, b2c, w3c, b3c)


@functools.partial(jax.jit, static_argnames=("tile_b",))
def elo_model_forward(x, packed_params, *, tile_b=2048):
    w1t, b1c, w2t, b2c, w3c, b3c = packed_params
    batch, input_size = x.shape
    tb, b_pad, n_tiles = _choose_tiling(batch, tile_b)

    # Only per-call x prep: zero-pad the batch dim (identity when b_pad == B).
    x_pad = x if b_pad == batch else jnp.pad(x, ((0, b_pad - batch), (0, 0)))

    flops = 2 * b_pad * (input_size * H1 + H1 * H2 + H2)
    bytes_accessed = (x_pad.size * 4 + w1t.size * 2 + w2t.size * 2
                      + (b1c.size + b2c.size + w3c.size + b3c.size) * 4
                      + b_pad * 4)

    const = lambda a: pl.BlockSpec(a.shape, lambda i: (0,) * a.ndim)
    out = pl.pallas_call(
        elo_mlp_kernel,
        out_shape=jax.ShapeDtypeStruct((1, b_pad), jnp.float32),
        grid=(n_tiles,),
        in_specs=[
            pl.BlockSpec((tb, input_size), lambda i: (i, 0)),      # x tile (pipelined)
            const(w1t), const(b1c),                                # weights stay resident
            const(w2t), const(b2c),
            const(w3c),
            pl.BlockSpec(memory_space=pltpu.MemorySpace.SMEM),     # b3 scalar
        ],
        out_specs=pl.BlockSpec((1, tb), lambda i: (0, i)),         # lane-dense store
        compiler_params=pltpu.CompilerParams(
            dimension_semantics=("parallel",)),
        cost_estimate=pl.CostEstimate(flops=flops, transcendentals=0,
                                      bytes_accessed=bytes_accessed),
    )(x_pad, w1t, b1c, w2t, b2c, w3c, b3c)

    return out[0, :batch][:, None]                                 # back to (B, 1)


def init_params(key, input_size):
    # Deterministic init mimicking nn.Linear's U(-1/sqrt(fan_in), 1/sqrt(fan_in)).
    def linear(k, fan_in, fan_out):
        kw, kb = jax.random.split(k)
        bound = 1.0 / jnp.sqrt(jnp.float32(fan_in))
        w = jax.random.uniform(kw, (fan_in, fan_out), jnp.float32, -bound, bound)
        b = jax.random.uniform(kb, (1, fan_out), jnp.float32, -bound, bound)
        return w, b

    k1, k2, k3 = jax.random.split(key, 3)
    w1, b1 = linear(k1, input_size, H1)
    w2, b2 = linear(k2, H1, H2)
    w3, b3 = linear(k3, H2, 1)
    return (w1, b1, w2, b2, w3, b3)


def reference_forward(x, params):
    # Pure-JAX reference with the SAME bf16-operand / f32-accumulate recipe as
    # the kernel (dropout is identity in eval mode; fc3 in f32 like the kernel).
    w1, b1, w2, b2, w3, b3 = params
    h1 = jnp.dot(x.astype(jnp.bfloat16), w1.astype(jnp.bfloat16),
                 preferred_element_type=jnp.float32) + b1
    h1 = jnp.maximum(h1, 0.0)
    h2 = jnp.dot(h1.astype(jnp.bfloat16), w2.astype(jnp.bfloat16),
                 preferred_element_type=jnp.float32) + b2
    h2 = jnp.maximum(h2, 0.0)
    return jnp.dot(h2, w3) + b3


if __name__ == "__main__":
    key = jax.random.PRNGKey(0)
    kx, kp = jax.random.split(key)

    batch = 8
    input_size = 32
    x = jax.random.normal(kx, (batch, input_size), jnp.float32)
    params = init_params(kp, input_size)
    packed = pack_params(params)

    out = jax.block_until_ready(elo_model_forward(x, packed))
    ref = reference_forward(x, params)

    assert out.shape == (batch, 1), out.shape
    max_err = jnp.max(jnp.abs(out - ref))
    assert jnp.allclose(out, ref, atol=5e-3, rtol=5e-3), \
        f"mismatch: max abs err {max_err}"

    print("KERNEL_OK")
</pallas_src>

<mosaic_0001>
module attributes {stable_mosaic.version = 11 : i64} {
  func.func @elo_mlp_kernel(%arg0: i32, %arg1: memref<128x32xf32, #tpu.memory_space<vmem>>, %arg2: memref<128x32xbf16, #tpu.memory_space<vmem>>, %arg3: memref<128x1xf32, #tpu.memory_space<vmem>>, %arg4: memref<64x128xbf16, #tpu.memory_space<vmem>>, %arg5: memref<64x1xf32, #tpu.memory_space<vmem>>, %arg6: memref<64x1xf32, #tpu.memory_space<vmem>>, %arg7: memref<1x1xf32, #tpu.memory_space<smem>>, %arg8: memref<1x128xf32, #tpu.memory_space<vmem>>) attributes {dimension_semantics = [#tpu.dimension_semantics<parallel>], iteration_bounds = array<i64: 1>, scalar_prefetch = 0 : i64, scratch_operands = 0 : i64, tpu.core_type = #tpu.core_type<tc>, window_params = [{transform_indices = @transform_0, window_bounds = array<i64: 128, 32>}, {pipeline_mode = #tpu.pipeline_mode<synchronous>, transform_indices = @transform_1, window_bounds = array<i64: 128, 32>}, {pipeline_mode = #tpu.pipeline_mode<synchronous>, transform_indices = @transform_2, window_bounds = array<i64: 128, 1>}, {pipeline_mode = #tpu.pipeline_mode<synchronous>, transform_indices = @transform_3, window_bounds = array<i64: 64, 128>}, {pipeline_mode = #tpu.pipeline_mode<synchronous>, transform_indices = @transform_4, window_bounds = array<i64: 64, 1>}, {pipeline_mode = #tpu.pipeline_mode<synchronous>, transform_indices = @transform_5, window_bounds = array<i64: 64, 1>}, {transform_indices = @transform_6, window_bounds = array<i64: 1, 1>}, {transform_indices = @transform_7, window_bounds = array<i64: 1, 128>}]} {
    %c0 = arith.constant 0 : index
    %c0_0 = arith.constant 0 : index
    %0 = vector.load %arg1[%c0, %c0_0] : memref<128x32xf32, #tpu.memory_space<vmem>>, vector<128x32xf32>
    %1 = arith.truncf %0 : vector<128x32xf32> to vector<128x32xbf16>
    %c0_1 = arith.constant 0 : index
    %c0_2 = arith.constant 0 : index
    %2 = vector.load %arg2[%c0_1, %c0_2] : memref<128x32xbf16, #tpu.memory_space<vmem>>, vector<128x32xbf16>
    %cst = arith.constant dense<0.000000e+00> : vector<128x128xf32>
    %3 = tpu.matmul %2, %1, %cst {dimension_numbers = #tpu.dot_dimension_numbers<[1], [1], [0], [0], [0, 0, 1, 0], [], []>} : vector<128x32xbf16>, vector<128x32xbf16>, vector<128x128xf32> -> vector<128x128xf32>
    %c0_3 = arith.constant 0 : index
    %c0_4 = arith.constant 0 : index
    %4 = vector.load %arg3[%c0_3, %c0_4] : memref<128x1xf32, #tpu.memory_space<vmem>>, vector<128x1xf32>
    %5 = vector.broadcast %4 : vector<128x1xf32> to vector<128x128xf32>
    %6 = arith.addf %3, %5 : vector<128x128xf32>
    %cst_5 = arith.constant 0.000000e+00 : f32
    %7 = vector.broadcast %cst_5 : f32 to vector<128x128xf32>
    %8 = arith.maximumf %6, %7 : vector<128x128xf32>
    %c0_6 = arith.constant 0 : index
    %c0_7 = arith.constant 0 : index
    %9 = vector.load %arg4[%c0_6, %c0_7] : memref<64x128xbf16, #tpu.memory_space<vmem>>, vector<64x128xbf16>
    %10 = arith.truncf %8 : vector<128x128xf32> to vector<128x128xbf16>
    %cst_8 = arith.constant dense<0.000000e+00> : vector<64x128xf32>
    %11 = tpu.matmul %9, %10, %cst_8 {dimension_numbers = #tpu.dot_dimension_numbers<[1], [0], [0], [1], [0, 0, 1, 1], [], []>} : vector<64x128xbf16>, vector<128x128xbf16>, vector<64x128xf32> -> vector<64x128xf32>
    %c0_9 = arith.constant 0 : index
    %c0_10 = arith.constant 0 : index
    %12 = vector.load %arg5[%c0_9, %c0_10] : memref<64x1xf32, #tpu.memory_space<vmem>>, vector<64x1xf32>
    %13 = vector.broadcast %12 : vector<64x1xf32> to vector<64x128xf32>
    %14 = arith.addf %11, %13 : vector<64x128xf32>
    %cst_11 = arith.constant 0.000000e+00 : f32
    %15 = vector.broadcast %cst_11 : f32 to vector<64x128xf32>
    %16 = arith.maximumf %14, %15 : vector<64x128xf32>
    %c0_12 = arith.constant 0 : index
    %c0_13 = arith.constant 0 : index
    %17 = vector.load %arg6[%c0_12, %c0_13] : memref<64x1xf32, #tpu.memory_space<vmem>>, vector<64x1xf32>
    %18 = vector.broadcast %17 : vector<64x1xf32> to vector<64x128xf32>
    %19 = arith.mulf %16, %18 : vector<64x128xf32>
    %cst_14 = arith.constant dense<0.000000e+00> : vector<128xf32>
    %20 = vector.multi_reduction <add>, %19, %cst_14 [0] : vector<64x128xf32> to vector<128xf32>
    %21 = vector.shape_cast %20 : vector<128xf32> to vector<1x128xf32>
    %c0_15 = arith.constant 0 : index
    %c0_16 = arith.constant 0 : index
    %22 = memref.load %arg7[%c0_15, %c0_16] : memref<1x1xf32, #tpu.memory_space<smem>>
    %23 = vector.broadcast %22 : f32 to vector<1x128xf32>
    %24 = arith.addf %21, %23 : vector<1x128xf32>
    %c0_17 = arith.constant 0 : index
    %c0_18 = arith.constant 0 : index
    %25 = vector.load %arg8[%c0_17, %c0_18] : memref<1x128xf32, #tpu.memory_space<vmem>>, vector<1x128xf32>
    tpu.vector_store %arg8[%c0_17, %c0_18], %24 {strides = array<i32>} : memref<1x128xf32, #tpu.memory_space<vmem>>, vector<1x128xf32>,
    return
  }
  func.func @transform_0(%arg0: i32) -> (i32, i32) {
    %c0_i32 = arith.constant 0 : i32
    %c0_i32_0 = arith.constant 0 : i32
    return %arg0, %c0_i32 : i32, i32
  }
  func.func @transform_1(%arg0: i32) -> (i32, i32) {
    %c0_i32 = arith.constant 0 : i32
    %c0_i32_0 = arith.constant 0 : i32
    %c0_i32_1 = arith.constant 0 : i32
    return %c0_i32, %c0_i32_0 : i32, i32
  }
  func.func @transform_2(%arg0: i32) -> (i32, i32) {
    %c0_i32 = arith.constant 0 : i32
    %c0_i32_0 = arith.constant 0 : i32
    %c0_i32_1 = arith.constant 0 : i32
    return %c0_i32, %c0_i32_0 : i32, i32
  }
  func.func @transform_3(%arg0: i32) -> (i32, i32) {
    %c0_i32 = arith.constant 0 : i32
    %c0_i32_0 = arith.constant 0 : i32
    %c0_i32_1 = arith.constant 0 : i32
    return %c0_i32, %c0_i32_0 : i32, i32
  }
  func.func @transform_4(%arg0: i32) -> (i32, i32) {
    %c0_i32 = arith.constant 0 : i32
    %c0_i32_0 = arith.constant 0 : i32
    %c0_i32_1 = arith.constant 0 : i32
    return %c0_i32, %c0_i32_0 : i32, i32
  }
  func.func @transform_5(%arg0: i32) -> (i32, i32) {
    %c0_i32 = arith.constant 0 : i32
    %c0_i32_0 = arith.constant 0 : i32
    %c0_i32_1 = arith.constant 0 : i32
    return %c0_i32, %c0_i32_0 : i32, i32
  }
  func.func @transform_6(%arg0: i32) -> (i32, i32) {
    %c0_i32 = arith.constant 0 : i32
    %c0_i32_0 = arith.constant 0 : i32
    %c0_i32_1 = arith.constant 0 : i32
    return %c0_i32, %c0_i32_0 : i32, i32
  }
  func.func @transform_7(%arg0: i32) -> (i32, i32) {
    %c0_i32 = arith.constant 0 : i32
    %c0_i32_0 = arith.constant 0 : i32
    return %c0_i32, %arg0 : i32, i32
  }
}

</mosaic_0001>

<bundles_post_ra>
// kernel: elo_model_forward.1
= control target key start
LH: loop header
LB: loop body
LE: loop exit
PB: predicated region body
PF: predicated region fallthrough
CT: control target
= control target key end

     0   :  { %vm204_vm0 = vcmask 261120   ;;  %v731_v3 = vmov 0   ;;  %s991_s0 = inlined_call_operand.vmem [shape: f32[128,32], index: 0, kind: input, shape index: {}]   ;;  %s992_s1 = inlined_call_operand.vmem [shape: bf16[128,32], index: 1, kind: input, shape index: {}]   ;;  %s993_s2 = inlined_call_operand.vmem [shape: f32[128,1], index: 2, kind: input, shape index: {}]   ;;  %s994_s4 = inlined_call_operand.vmem [shape: f32[64,1], index: 4, kind: input, shape index: {}]   ;;  %s995_s5 = inlined_call_operand.vmem [shape: f32[64,1], index: 5, kind: input, shape index: {}]   ;;  %s996_s3 = inlined_call_operand.vmem [shape: bf16[64,128], index: 3, kind: input, shape index: {}]   ;;  %s997_s6 = inlined_call_operand.<no memory space> [shape: f32[1,1], index: 6, kind: input, shape index: {}]   ;;  %s998_s7 = inlined_call_operand.vmem [shape: f32[1,128], index: 7, kind: output, shape index: {}]  }
   0x1   :  { %v42_v0 = vld [vmem:[%s991_s0 + $0x70] sm:$0xff]  ;;  %v43_v1 = vld [vmem:[%s991_s0 + $0x78] sm:$0xff]  ;;  %v40_v2 = vld [vmem:[%s991_s0 + $0x60] sm:$0xff]  ;;  %717 = vset.pattern.permute.xlu0 %v731_v3  ;;  %718 = vset.pattern.permute.xlu1 %v731_v3 }
   0x2   :  { %v51_v4 = vpack.c.bf16 %v43_v1, %v42_v0  ;;  %v41_v5 = vld [vmem:[%s991_s0 + $0x68] sm:$0xff]  ;;  %v38_v8 = vld [vmem:[%s991_s0 + $0x50] sm:$0xff]  ;;  %v39_v9 = vld [vmem:[%s991_s0 + $0x58] sm:$0xff] }
   0x3   :  { %v50_v6 = vpack.c.bf16 %v41_v5, %v40_v2  ;;  %v719_v10 = vld [vmem:[%s992_s1] sm:$0xff]   ;;  %v49_v12 = vpack.c.bf16 %v39_v9, %v38_v8  ;;  %v82_v13 = vld [vmem:[%s993_s2 + $0x70] sm:$0xff]  ;;  %v37_v15 = vld [vmem:[%s991_s0 + $0x48] sm:$0xff] }
   0x4   :  { %708 = vmatprep.subr.msk.bf16.mxu0 %vm204_vm0, %v51_v4  ;;  %v251_v7 = vsel %vm204_vm0, %v51_v4, 0  ;;  %668 = vmatprep.mubr.msk.bf16.mxu0 %vm204_vm0, %v719_v10  ;;  %v36_v14 = vld [vmem:[%s991_s0 + $0x40] sm:$0xff]  ;;  %v83_v17 = vld [vmem:[%s993_s2 + $0x78] sm:$0xff]  ;;  %v81_v18 = vld [vmem:[%s993_s2 + $0x68] sm:$0xff] }
   0x5   :  { %653 = vmatpush3.bf16.xpose.msra.mxu0 %v251_v7  ;;  %v248_v11 = vsel %vm204_vm0, %v50_v6, 0  ;;  %156 = vperm.xlu0 %717, %v82_v13   ;;  %v80_v16 = vld [vmem:[%s993_s2 + $0x60] sm:$0xff]  ;;  %v245_v19 = vsel %vm204_vm0, %v49_v12, 0  ;;  %v48_v20 = vpack.c.bf16 %v37_v15, %v36_v14  ;;  %v78_v21 = vld [vmem:[%s993_s2 + $0x50] sm:$0xff]  ;;  %v79_v22 = vld [vmem:[%s993_s2 + $0x58] sm:$0xff] }
   0x6   :  { %709 = vmatprep.subr.msk.bf16.mxu0 %vm204_vm0, %v50_v6  ;;  %146 = vperm.xlu1 %718, %v80_v16   ;;  %v34_v23 = vld [vmem:[%s991_s0 + $0x30] sm:$0xff]  ;;  %v35_v24 = vld [vmem:[%s991_s0 + $0x38] sm:$0xff]  ;;  %v76_v25 = vld [vmem:[%s993_s2 + $0x40] sm:$0xff] }
   0x7   :  { %v77_v26 = vld [vmem:[%s993_s2 + $0x48] sm:$0xff]  ;;  %v242_v27 = vsel %vm204_vm0, %v48_v20, 0  ;;  %v47_v28 = vpack.c.bf16 %v35_v24, %v34_v23  ;;  %v74_v29 = vld [vmem:[%s993_s2 + $0x30] sm:$0xff]  ;;  %v75_v30 = vld [vmem:[%s993_s2 + $0x38] sm:$0xff] }
   0x8   :  { %v32_v31 = vld [vmem:[%s991_s0 + $0x20] sm:$0xff]  ;;  %v33_v32 = vld [vmem:[%s991_s0 + $0x28] sm:$0xff]  ;;  %v70_v37 = vld [vmem:[%s993_s2 + $0x10] sm:$0xff] }
   0x9   :  { %161 = vperm.xlu0 %717, %v83_v17   ;;  %v72_v33 = vld [vmem:[%s993_s2 + $0x20] sm:$0xff]  ;;  %v73_v34 = vld [vmem:[%s993_s2 + $0x28] sm:$0xff]  ;;  %v239_v35 = vsel %vm204_vm0, %v47_v28, 0  ;;  %v46_v36 = vpack.c.bf16 %v33_v32, %v32_v31  ;;  %v71_v38 = vld [vmem:[%s993_s2 + $0x18] sm:$0xff] }
   0xa   :  { %151 = vperm.xlu1 %718, %v81_v18   ;;  %v30_v39 = vld [vmem:[%s991_s0 + $0x10] sm:$0xff]  ;;  %v31_v40 = vld [vmem:[%s991_s0 + $0x18] sm:$0xff]  ;;  %v68_v41 = vld [vmem:[%s993_s2] sm:$0xff] }
   0xb   :  { %v69_v42 = vld [vmem:[%s993_s2 + $0x8] sm:$0xff]  ;;  %v236_v43 = vsel %vm204_vm0, %v46_v36, 0  ;;  %v45_v44 = vpack.c.bf16 %v31_v40, %v30_v39  ;;  %v382_v45 = vld [vmem:[%s994_s4] sm:$0xff]  ;;  %v384_v49 = vld [vmem:[%s994_s4 + $0x10] sm:$0xff] }
   0xc   :  { %v383_v46 = vld [vmem:[%s994_s4 + $0x8] sm:$0xff]  ;;  %v28_v47 = vld [vmem:[%s991_s0] sm:$0xff]  ;;  %v385_v50 = vld [vmem:[%s994_s4 + $0x18] sm:$0xff] }
   0xd   :  { %655 = vmatpush3.bf16.xpose.msra.mxu0 %v248_v11  ;;  %136 = vperm.xlu0 %717, %v78_v21   ;;  %v29_v48 = vld [vmem:[%s991_s0 + $0x8] sm:$0xff]  ;;  %v233_v51 = vsel %vm204_vm0, %v45_v44, 0  ;;  %v527_v53 = vld [vmem:[%s995_s5] sm:$0xff]  ;;  %v529_v56 = vld [vmem:[%s995_s5 + $0x10] sm:$0xff] }
   0xe   :  { %710 = vmatprep.subr.msk.bf16.mxu0 %vm204_vm0, %v49_v12  ;;  %141 = vperm.xlu1 %718, %v79_v22   ;;  %v44_v52 = vpack.c.bf16 %v29_v48, %v28_v47  ;;  %v528_v54 = vld [vmem:[%s995_s5 + $0x8] sm:$0xff]  ;;  %v386_v55 = vld [vmem:[%s994_s4 + $0x20] sm:$0xff]  ;;  %v530_v59 = vld [vmem:[%s995_s5 + $0x18] sm:$0xff] }
   0xf   :  { %v387_v58 = vld [vmem:[%s994_s4 + $0x28] sm:$0xff]  ;;  %v388_v61 = vld [vmem:[%s994_s4 + $0x30] sm:$0xff]  ;;  %v531_v63 = vld [vmem:[%s995_s5 + $0x20] sm:$0xff] }
  0x10   :  { %v230_v57 = vsel %vm204_vm0, %v44_v52, 0  ;;  %v720_v60 = vld [vmem:[%s992_s1 + $0x8] sm:$0xff]   ;;  %v721_v62 = vld [vmem:[%s992_s1 + $0x10] sm:$0xff]   ;;  %v389_v0 = vld [vmem:[%s994_s4 + $0x38] sm:$0xff] }
  0x11   :  { %126 = vperm.xlu0 %717, %v76_v25   ;;  %v532_v1 = vld [vmem:[%s995_s5 + $0x28] sm:$0xff]  ;;  %v722_v2 = vld [vmem:[%s992_s1 + $0x18] sm:$0xff]   ;;  %v533_v3 = vld [vmem:[%s995_s5 + $0x30] sm:$0xff] }
  0x12   :  { %131 = vperm.xlu1 %718, %v77_v26   ;;  %v723_v4 = vld [vmem:[%s992_s1 + $0x20] sm:$0xff]   ;;  %v534_v5 = vld [vmem:[%s995_s5 + $0x38] sm:$0xff]  ;;  %v724_v6 = vld [vmem:[%s992_s1 + $0x28] sm:$0xff]  }
  0x13   :  { %v725_v7 = vld [vmem:[%s992_s1 + $0x30] sm:$0xff]   ;;  %v726_v8 = vld [vmem:[%s992_s1 + $0x38] sm:$0xff]   ;;  %v727_v9 = vld [vmem:[%s996_s3] sm:$0xff]  }
  0x14   :  { %700 = vmatprep.mubr.bf16.mxu1 %v727_v9 }
  0x15   :  { %657 = vmatpush3.bf16.xpose.msra.mxu0 %v245_v19  ;;  %116 = vperm.xlu0 %717, %v74_v29  }
  0x16   :  { %711 = vmatprep.subr.msk.bf16.mxu0 %vm204_vm0, %v48_v20  ;;  %121 = vperm.xlu1 %718, %v75_v30  }
  0x19   :  { %106 = vperm.xlu0 %717, %v72_v33  }
  0x1a   :  { %111 = vperm.xlu1 %718, %v73_v34  }
  0x1d   :  { %659 = vmatpush3.bf16.xpose.msra.mxu0 %v242_v27  ;;  %96 = vperm.xlu0 %717, %v70_v37  }
  0x1e   :  { %712 = vmatprep.subr.msk.bf16.mxu0 %vm204_vm0, %v47_v28  ;;  %101 = vperm.xlu1 %718, %v71_v38  }
  0x21   :  { %86 = vperm.xlu0 %717, %v68_v41  }
  0x22   :  { %91 = vperm.xlu1 %718, %v69_v42  }
  0x25   :  { %661 = vmatpush3.bf16.xpose.msra.mxu0 %v239_v35  ;;  %392 = vperm.xlu0 %717, %v382_v45  }
  0x26   :  { %713 = vmatprep.subr.msk.bf16.mxu0 %vm204_vm0, %v46_v36  ;;  %397 = vperm.xlu1 %718, %v383_v46  }
  0x29   :  { %402 = vperm.xlu0 %717, %v384_v49  }
  0x2a   :  { %407 = vperm.xlu1 %718, %v385_v50  }
  0x2d   :  { %663 = vmatpush3.bf16.xpose.msra.mxu0 %v236_v43  ;;  %537 = vperm.xlu0 %717, %v527_v53  }
  0x2e   :  { %714 = vmatprep.subr.msk.bf16.mxu0 %vm204_vm0, %v45_v44  ;;  %542 = vperm.xlu1 %718, %v528_v54  }
  0x31   :  { %412 = vperm.xlu0 %717, %v386_v55  }
  0x32   :  { %547 = vperm.xlu1 %718, %v529_v56  }
  0x35   :  { %665 = vmatpush3.bf16.xpose.msra.mxu0 %v233_v51  ;;  %417 = vperm.xlu0 %717, %v387_v58  }
  0x36   :  { %715 = vmatprep.subr.msk.bf16.mxu0 %vm204_vm0, %v44_v52  ;;  %552 = vperm.xlu1 %718, %v530_v59  }
  0x39   :  { %422 = vperm.xlu0 %717, %v388_v61  }
  0x3a   :  { %557 = vperm.xlu1 %718, %v531_v63  }
  0x3d   :  { %667 = vmatpush3.bf16.xpose.msra.mxu0 %v230_v57  ;;  %427 = vperm.xlu0 %717, %v389_v0  }
  0x3e   :  { %562 = vperm.xlu1 %718, %v532_v1  }
  0x41   :  { %567 = vperm.xlu0 %717, %v533_v3  }
  0x42   :  { %572 = vperm.xlu1 %718, %v534_v5  }
  0x44   :  { %669 = vmatmul.mubr.msk.bf16.vlgmr.msra.gmra.mxu0 %vm204_vm0, %v720_v60 }
  0x45   :  { %672 = vmatprep.mubr.msk.bf16.mxu0 %vm204_vm0, %v721_v62 }
  0x4c   :  { %673 = vmatmul.mubr.msk.bf16.gmra.mxu0 %vm204_vm0, %v722_v2 }
  0x4d   :  { %676 = vmatprep.mubr.msk.bf16.mxu0 %vm204_vm0, %v723_v4 }
  0x54   :  { %677 = vmatmul.mubr.msk.bf16.gmra.mxu0 %vm204_vm0, %v724_v6 }
  0x55   :  { %680 = vmatprep.mubr.msk.bf16.mxu0 %vm204_vm0, %v725_v7 }
  0x5c   :  { %681 = vmatmul.mubr.msk.bf16.gmra.mxu0 %vm204_vm0, %v726_v8 }
  0x80   :  { %v157_v16 = vpop.permute.xlu0 %156 }
  0x81   :  { %v147_v14 = vpop.permute.xlu1 %146 }
  0x84   :  { %v162_v21 = vpop.permute.xlu0 %161 }
  0x85   :  { %v152_v19 = vpop.permute.xlu1 %151 }
  0x88   :  { %v137_v26 = vpop.permute.xlu0 %136 }
  0x89   :  { %v142_v24 = vpop.permute.xlu1 %141 }
  0x8c   :  { %v127_v32 = vpop.permute.xlu0 %126 }
  0x8d   :  { %v132_v29 = vpop.permute.xlu1 %131 }
  0x90   :  { %v117_v46 = vpop.permute.xlu0 %116 }
  0x91   :  { %v122_v41 = vpop.permute.xlu1 %121 }
  0x94   :  { %v107_v56 = vpop.permute.xlu0 %106 }
  0x95   :  { %v112_v52 = vpop.permute.xlu1 %111 }
  0x98   :  { %v97_v1 = vpop.permute.xlu0 %96 }
  0x99   :  { %v102_v62 = vpop.permute.xlu1 %101 }
  0x9d   :  { %v92_v7 = vpop.permute.xlu1 %91 }
 0x104   :  { %v967_v10 = vpop.f32.mrf.mxu0 }
 0x105   :  { %v296_v5 = vadd.f32 %v967_v10, %v97_v1  ;;  %v728_v10 = vld [vmem:[%s996_s3 + $0x8] sm:$0xff]  }
 0x106   :  { %v969_v11 = vpop.f32.mrf.mxu0 }
 0x108   :  { %v671_v12 = vpop.f32.mrf.mxu0 }
 0x109   :  { %v299_v2 = vadd.f32 %v671_v12, %v102_v62 }
 0x10a   :  { %v971_v13 = vpop.f32.mrf.mxu0 }
 0x10b   :  { %v353_v8 = vmax.f32 %v299_v2, 0.0  ;;  %v291_v9 = vadd.f32 %v971_v13, %v92_v7  ;;  %v729_v13 = vld [vmem:[%s996_s3 + $0x10] sm:$0xff]  }
 0x10c   :  { %v674_v15 = vpop.f32.mrf.mxu0 }
 0x10d   :  { %v312_v57 = vadd.f32 %v674_v15, %v117_v46  ;;  %v87_v15 = vpop.permute.xlu0 %86  ;;  %v351_v12 = vmax.f32 %v291_v9, 0.0 }
 0x10e   :  { %v303_v17 = vpop.f32.mrf.mxu0 }
 0x10f   :  { %v356_v63 = vmax.f32 %v312_v57, 0.0  ;;  %v304_v0 = vadd.f32 %v303_v17, %v107_v56  ;;  %v288_v17 = vadd.f32 %v969_v11, %v87_v15  ;;  %v730_v11 = vld [vmem:[%s996_s3 + $0x18] sm:$0xff]  }
 0x110   :  { %v675_v18 = vpop.f32.mrf.mxu0 }
 0x111   :  { %v315_v53 = vadd.f32 %v675_v18, %v122_v41  ;;  %v354_v6 = vmax.f32 %v304_v0, 0.0 }
 0x112   :  { %v306_v20 = vpop.f32.mrf.mxu0 }
 0x113   :  { %v357_v59 = vmax.f32 %v315_v53, 0.0  ;;  %v307_v60 = vadd.f32 %v306_v20, %v112_v52 }
 0x114   :  { %v678_v22 = vpop.f32.mrf.mxu0 }
 0x115   :  { %v328_v42 = vadd.f32 %v678_v22, %v137_v26  ;;  %v377_v3 = vpack.c.bf16 %v357_v59, %v356_v63  ;;  %v355_v4 = vmax.f32 %v307_v60, 0.0  ;;  %v398_v22 = vpop.permute.xlu1 %397 }
 0x116   :  { %v319_v23 = vpop.f32.mrf.mxu0 }
 0x117   :  { %v360_v50 = vmax.f32 %v328_v42, 0.0  ;;  %v320_v51 = vadd.f32 %v319_v23, %v127_v32 }
 0x118   :  { %v679_v25 = vpop.f32.mrf.mxu0 }
 0x119   :  { %v331_v37 = vadd.f32 %v679_v25, %v142_v24  ;;  %v358_v58 = vmax.f32 %v320_v51, 0.0  ;;  %v408_v24 = vpop.permute.xlu1 %407 }
 0x11a   :  { %v322_v27 = vpop.f32.mrf.mxu0 }
 0x11b   :  { %v361_v47 = vmax.f32 %v331_v37, 0.0  ;;  %v323_v48 = vadd.f32 %v322_v27, %v132_v29 }
 0x11c   :  { %v682_v28 = vpop.f32.mrf.mxu0 }
 0x11d   :  { %v344_v31 = vadd.f32 %v682_v28, %v157_v16  ;;  %v379_v54 = vpack.c.bf16 %v361_v47, %v360_v50  ;;  %v359_v55 = vmax.f32 %v323_v48, 0.0  ;;  %v352_v16 = vmax.f32 %v296_v5, 0.0  ;;  %v543_v26 = vpop.permute.xlu1 %542 }
 0x11e   :  { %v335_v30 = vpop.f32.mrf.mxu0 }
 0x11f   :  { %v336_v34 = vadd.f32 %v335_v30, %v147_v14  ;;  %v364_v38 = vmax.f32 %v344_v31, 0.0  ;;  %v378_v61 = vpack.c.bf16 %v359_v55, %v358_v58  ;;  %v376_v14 = vpack.c.bf16 %v355_v4, %v354_v6 }
 0x120   :  { %v683_v33 = vpop.f32.mrf.mxu0  ;;  %v375_v18 = vpack.c.bf16 %v353_v8, %v352_v16 }
 0x121   :  { %v347_v35 = vadd.f32 %v683_v33, %v162_v21  ;;  %v362_v43 = vmax.f32 %v336_v34, 0.0  ;;  %v393_v21 = vpop.permute.xlu0 %392  ;;  %v548_v28 = vpop.permute.xlu1 %547 }
 0x122   :  { %v338_v36 = vpop.f32.mrf.mxu0 }
 0x123   :  { %v365_v39 = vmax.f32 %v347_v35, 0.0  ;;  %v339_v40 = vadd.f32 %v338_v36, %v152_v19  ;;  %v350_v19 = vmax.f32 %v288_v17, 0.0 }
 0x125   :  { %v363_v44 = vmax.f32 %v339_v40, 0.0  ;;  %v381_v45 = vpack.c.bf16 %v365_v39, %v364_v38  ;;  %v374_v20 = vpack.c.bf16 %v351_v12, %v350_v19  ;;  %v403_v23 = vpop.permute.xlu0 %402  ;;  %v553_v33 = vpop.permute.xlu1 %552 }
 0x127   :  { %v380_v49 = vpack.c.bf16 %v363_v44, %v362_v43  ;;  %684 = vmatprep.subr.bf16.mxu1 %v381_v45 }
 0x128   :  { %685 = vmatpush3.bf16.msra.mxu1 %v381_v45 }
 0x129   :  { %686 = vmatprep.subr.bf16.mxu1 %v380_v49  ;;  %v538_v25 = vpop.permute.xlu0 %537  ;;  %v558_v44 = vpop.permute.xlu1 %557 }
 0x12c   :  { %687 = vmatpush3.bf16.msra.mxu1 %v380_v49 }
 0x12d   :  { %688 = vmatprep.subr.bf16.mxu1 %v379_v54  ;;  %v413_v27 = vpop.permute.xlu0 %412 }
 0x130   :  { %689 = vmatpush3.bf16.msra.mxu1 %v379_v54 }
 0x131   :  { %690 = vmatprep.subr.bf16.mxu1 %v378_v61  ;;  %v418_v30 = vpop.permute.xlu0 %417 }
 0x134   :  { %691 = vmatpush3.bf16.msra.mxu1 %v378_v61  ;;  %v563_v61 = vpop.permute.xlu1 %562 }
 0x135   :  { %692 = vmatprep.subr.bf16.mxu1 %v377_v3  ;;  %v423_v40 = vpop.permute.xlu0 %422 }
 0x138   :  { %693 = vmatpush3.bf16.msra.mxu1 %v377_v3  ;;  %v573_v8 = vpop.permute.xlu1 %572 }
 0x139   :  { %694 = vmatprep.subr.bf16.mxu1 %v376_v14  ;;  %v428_v55 = vpop.permute.xlu0 %427 }
 0x13c   :  { %695 = vmatpush3.bf16.msra.mxu1 %v376_v14 }
 0x13d   :  { %696 = vmatprep.subr.bf16.mxu1 %v375_v18  ;;  %v568_v5 = vpop.permute.xlu0 %567 }
 0x140   :  { %697 = vmatpush3.bf16.msra.mxu1 %v375_v18 }
 0x141   :  { %698 = vmatprep.subr.bf16.mxu1 %v374_v20 }
 0x144   :  { %699 = vmatpush3.bf16.msra.mxu1 %v374_v20  ;;  %v597_v20 = vstv %s997_s6 }
 0x147   :  { %701 = vmatmul.mubr.bf16.vlgmr.msra.gmra.mxu1 %v728_v10 }
 0x148   :  { %704 = vmatprep.mubr.bf16.mxu1 %v729_v13 }
 0x14f   :  { %705 = vmatmul.mubr.bf16.gmra.mxu1 %v730_v11 }
 0x207   :  { %v702_v29 = vpop.f32.mrf.mxu1 }
 0x208   :  { %v497_v35 = vadd.f32 %v702_v29, %v403_v23 }
 0x209   :  { %v488_v31 = vpop.f32.mrf.mxu1 }
 0x20a   :  { %v489_v32 = vadd.f32 %v488_v31, %v393_v21  ;;  %v521_v42 = vmax.f32 %v497_v35, 0.0 }
 0x20b   :  { %v703_v34 = vpop.f32.mrf.mxu1 }
 0x20c   :  { %v519_v37 = vmax.f32 %v489_v32, 0.0  ;;  %v500_v38 = vadd.f32 %v703_v34, %v408_v24  ;;  %v577_v51 = vmul.f32 %v548_v28, %v521_v42 }
 0x20d   :  { %v491_v36 = vpop.f32.mrf.mxu1 }
 0x20e   :  { %v492_v39 = vadd.f32 %v491_v36, %v398_v22  ;;  %v575_v46 = vmul.f32 %v538_v25, %v519_v37  ;;  %v522_v47 = vmax.f32 %v500_v38, 0.0 }
 0x20f   :  { %v706_v41 = vpop.f32.mrf.mxu1 }
 0x210   :  { %v520_v43 = vmax.f32 %v492_v39, 0.0  ;;  %v513_v53 = vadd.f32 %v706_v41, %v423_v40  ;;  %v578_v57 = vmul.f32 %v553_v33, %v522_v47 }
 0x211   :  { %v504_v45 = vpop.f32.mrf.mxu1 }
 0x212   :  { %v576_v48 = vmul.f32 %v543_v26, %v520_v43  ;;  %v505_v49 = vadd.f32 %v504_v45, %v413_v27  ;;  %v525_v62 = vmax.f32 %v513_v53, 0.0 }
 0x213   :  { %v707_v50 = vpop.f32.mrf.mxu1 }
 0x214   :  { %v583_v52 = vadd.f32 %v576_v48, %v575_v46  ;;  %v523_v54 = vmax.f32 %v505_v49, 0.0  ;;  %v516_v59 = vadd.f32 %v707_v50, %v428_v55  ;;  %v581_v6 = vmul.f32 %v568_v5, %v525_v62 }
 0x215   :  { %v507_v56 = vpop.f32.mrf.mxu1 }
 0x216   :  { %v584_v58 = vadd.f32 %v583_v52, %v577_v51  ;;  %v508_v60 = vadd.f32 %v507_v56, %v418_v30  ;;  %v579_v63 = vmul.f32 %v558_v44, %v523_v54  ;;  %v526_v3 = vmax.f32 %v516_v59, 0.0 }
 0x218   :  { %v585_v0 = vadd.f32 %v584_v58, %v578_v57  ;;  %v524_v1 = vmax.f32 %v508_v60, 0.0  ;;  %v582_v9 = vmul.f32 %v573_v8, %v526_v3 }
 0x21a   :  { %v586_v2 = vadd.f32 %v585_v0, %v579_v63  ;;  %v580_v4 = vmul.f32 %v563_v61, %v524_v1 }
 0x21c   :  { %v587_v7 = vadd.f32 %v586_v2, %v580_v4 }
 0x21e   :  { %v588_v14 = vadd.f32 %v587_v7, %v581_v6 }
 0x220   :  { %v589_v15 = vadd.f32 %v588_v14, %v582_v9 }
 0x222   :  { %v590_v16 = vrot.slane %v589_v15, 4 }
 0x224   :  { %v591_v17 = vadd.f32 %v590_v16, %v589_v15 }
 0x226   :  { %v592_v18 = vrot.slane %v591_v17, 2 }
 0x228   :  { %v593_v12 = vadd.f32 %v592_v18, %v591_v17 }
 0x22a   :  { %v594_v19 = vrot.slane %v593_v12, 1 }
 0x22c   :  { %v595_v10 = vadd.f32 %v594_v19, %v593_v12 }
 0x22e   :  { %v598_v13 = vadd.f32 %v597_v20, %v595_v10 }
 0x230   :  { %599 = vst [vmem:[%s998_s7] sm:$0x1] %v598_v13 }

</bundles_post_ra>
